<compile_context>
chip_gen: v5e
topology: v5e:2x2
jax: 0.10.0
libtpu: 0.0.40
codegen_flags: <defaults>
</compile_context>

<pallas_src>
import functools

import jax
import jax.numpy as jnp
from jax.experimental import pallas as pl
from jax.experimental.pallas import tpu as pltpu


_NEG_BIG = -1.0e30          # finite "-inf": masked columns never create 0*inf
_VOCAB_ALIGN = 2048         # big vocabs padded to this so pow2 tiles divide it


def _round_up(x, m):
    return ((x + m - 1) // m) * m


def _vmem_capacity_bytes():
    try:
        return int(pltpu.get_tpu_info().vmem_capacity_bytes)
    except Exception:
        return 64 * 1024 * 1024     # safe fallback on every generation


def _prepare_weight_t(weight):
    """(V, H) nn.Linear weight -> transposed + vocab-padded (H, V_pad)."""
    V = weight.shape[0]
    if V <= _VOCAB_ALIGN:
        V_pad = _round_up(V, 128)
    else:
        V_pad = _round_up(V, _VOCAB_ALIGN)
    wt = weight.T
    if V_pad != V:
        wt = jnp.pad(wt, ((0, 0), (0, V_pad - V)))
    return wt


def _select_vocab_tile(V_pad, target):
    """Largest multiple-of-128 tile <= target that divides V_pad."""
    if target >= V_pad:
        return V_pad
    if target % 128 == 0 and V_pad % target == 0:
        return target
    for cand in range(target - target % 128, 127, -128):
        if V_pad % cand == 0:
            return cand
    return V_pad


def _fused_linear_jsd_kernel(sx_ref, tx_ref, swt_ref, twt_ref, out_ref,
                             m_s, l_s, m_t, l_t, acc, *cache_refs,
                             beta, temperature, vt, valid_v, v_pad, use_cache):
    phase = pl.program_id(1)          # 0: online LSE pass, 1: JSD pass
    j = pl.program_id(2)              # vocab-tile index within the phase
    nv = pl.num_programs(2)
    last_j = nv - 1
    need_mask = (v_pad != valid_v)    # static Python bool

    @pl.when((phase == 0) & (j == 0))
    def _init():
        m_s[...] = jnp.full_like(m_s, -jnp.inf)
        m_t[...] = jnp.full_like(m_t, -jnp.inf)
        l_s[...] = jnp.zeros_like(l_s)
        l_t[...] = jnp.zeros_like(l_t)
        acc[...] = jnp.zeros_like(acc)

    # Fold online (m, l) into the final LSE exactly once per row tile instead
    # of recomputing m + log(l) at every phase-1 vocab step.
    @pl.when((phase == 1) & (j == 0))
    def _fold_lse():
        m_s[...] = m_s[...] + jnp.log(l_s[...])
        m_t[...] = m_t[...] + jnp.log(l_t[...])

    def compute_logits(col_tile):
        sx = sx_ref[...]
        tx = tx_ref[...]
        if temperature != 1.0:        # static: zero cost when T == 1
            inv_t = 1.0 / temperature
            sx = sx * jnp.asarray(inv_t, sx.dtype)
            tx = tx * jnp.asarray(inv_t, tx.dtype)
        zs = jnp.dot(sx, swt_ref[...], preferred_element_type=jnp.float32)
        zt = jnp.dot(tx, twt_ref[...], preferred_element_type=jnp.float32)
        if need_mask:                 # static: only when V was padded
            col = col_tile * vt + jax.lax.broadcasted_iota(jnp.int32, zs.shape, 1)
            keep = col < valid_v
            zs = jnp.where(keep, zs, _NEG_BIG)
            zt = jnp.where(keep, zt, _NEG_BIG)
        return zs, zt

    def online_lse(zs, zt):
        ms_new = jnp.maximum(m_s[...], jnp.max(zs, axis=-1, keepdims=True))
        l_s[...] = (l_s[...] * jnp.exp(m_s[...] - ms_new)
                    + jnp.sum(jnp.exp(zs - ms_new), axis=-1, keepdims=True))
        m_s[...] = ms_new
        mt_new = jnp.maximum(m_t[...], jnp.max(zt, axis=-1, keepdims=True))
        l_t[...] = (l_t[...] * jnp.exp(m_t[...] - mt_new)
                    + jnp.sum(jnp.exp(zt - mt_new), axis=-1, keepdims=True))
        m_t[...] = mt_new

    def jsd_accum(zs, zt):
        x = zs - m_s[...]             # student log-probs (m_s holds LSE now)
        y = zt - m_t[...]             # teacher log-probs
        if beta == 0.0:               # forward KL(P || Q)
            elem = jnp.exp(y) * (y - x)
        elif beta == 1.0:             # reverse KL(Q || P)
            elem = jnp.exp(x) * (x - y)
        else:                         # generalized JSD
            q = jnp.exp(x)
            p = jnp.exp(y)
            mix = beta * p + (1.0 - beta) * q
            # underflow guard: keep log_m finite so 0 * (-inf) never appears
            log_m = jnp.log(jnp.maximum(mix, jnp.finfo(jnp.float32).tiny))
            elem = beta * p * (y - log_m) + (1.0 - beta) * q * (x - log_m)
        acc[...] += jnp.sum(elem, axis=-1, keepdims=True)

    if use_cache:
        zs_cache, zt_cache = cache_refs

        @pl.when(phase == 0)
        def _pass0():
            zs, zt = compute_logits(j)
            zs_cache[j] = zs          # f32 logit tiles cached in VMEM scratch
            zt_cache[j] = zt
            online_lse(zs, zt)

        @pl.when(phase == 1)          # weight index_map is pinned -> no DMA,
        def _pass1():                 # no matmul: pure VPU/EUP pass over cache
            jsd_accum(zs_cache[j], zt_cache[j])
    else:
        # Recompute fallback: serpentine vocab order in phase 1 so the tile at
        # the phase boundary is reused (one weight-tile DMA saved per row).
        je = jnp.where(phase == 0, j, last_j - j)
        zs, zt = compute_logits(je)

        @pl.when(phase == 0)
        def _pass0():
            online_lse(zs, zt)

        @pl.when(phase == 1)
        def _pass1():
            jsd_accum(zs, zt)

    @pl.when((phase == 1) & (j == last_j))
    def _finalize():
        out_ref[...] = acc[...]


def fused_linear_jsd(student_input, student_weight, teacher_input,
                     teacher_weight, label=None, *, beta=0.5,
                     ignore_index=-100, temperature=1.0,
                     weights_pretransposed=False, vocab_size=None,
                     row_tile=None, vocab_tile=None, use_logit_cache=None):
    BT, Hs = student_input.shape
    BT_t, H = teacher_input.shape
    assert BT_t == BT

    if weights_pretransposed:
        swt, twt = student_weight, teacher_weight     # (Hs, V_pad), (H, V_pad)
        V = int(vocab_size) if vocab_size is not None else swt.shape[1]
    else:
        V = student_weight.shape[0]
        assert teacher_weight.shape[0] == V
        swt = _prepare_weight_t(student_weight)
        twt = _prepare_weight_t(teacher_weight)
    V_pad = swt.shape[1]
    assert twt.shape[1] == V_pad and swt.shape[0] == Hs and twt.shape[0] == H

    # ---- generation-aware VMEM budget / tile selection ----
    vmem_cap = _vmem_capacity_bytes()
    vmem_limit = max(32 * 1024 * 1024,
                     min(int(vmem_cap * 0.75), 110 * 1024 * 1024))
    budget = int(vmem_limit * 0.85)          # headroom for compiler scratch
    big_vmem = vmem_cap >= 96 * 1024 * 1024  # v5e/v6e (128 MiB) vs v7x (64 MiB)

    rt_target = int(row_tile) if row_tile is not None else (512 if big_vmem else 256)
    vt_target = int(vocab_tile) if vocab_tile is not None else (2048 if big_vmem else 1024)

    rt = min(rt_target, _round_up(BT, 8))
    rt = max(8, rt - rt % 8)
    vt = _select_vocab_tile(V_pad, vt_target)

    w_isize = jnp.dtype(swt.dtype).itemsize
    a_isize = jnp.dtype(student_input.dtype).itemsize

    def usage(rt_, vt_, cache_):
        weight_tiles = (Hs + H) * vt_ * w_isize * 2     # double-buffered
        acts = rt_ * (Hs + H) * a_isize * 2             # double-buffered
        logits_tmp = rt_ * vt_ * 4 * 2                  # f32 zs / zt values
        cache_b = rt_ * V_pad * 4 * 2 if cache_ else 0  # f32 logit cache
        return weight_tiles + acts + logits_tmp + cache_b + (2 << 20)

    while usage(rt, vt, False) > budget:
        new_vt = vt // 2
        if new_vt >= 128 and new_vt % 128 == 0 and V_pad % new_vt == 0:
            vt = new_vt
            continue
        if rt > 8:
            rt = max(8, (rt // 2) // 8 * 8)
            continue
        break

    if use_logit_cache is None or use_logit_cache:
        use_cache = usage(rt, vt, True) <= budget
    else:
        use_cache = False

    # ---- pad rows up to a multiple of the row tile ----
    BT_pad = _round_up(BT, rt)
    if BT_pad != BT:
        pad = BT_pad - BT
        student_input = jnp.pad(student_input, ((0, pad), (0, 0)))
        teacher_input = jnp.pad(teacher_input, ((0, pad), (0, 0)))

    nv = V_pad // vt

    if use_cache:
        # phase 1: pinned at the last tile -> zero weight DMA during phase 1
        w_map = lambda i, p, j: (0, j * (1 - p) + (nv - 1) * p)
    else:
        # phase 1: serpentine -> boundary tile reused across the transition
        w_map = lambda i, p, j: (0, j + p * (nv - 1 - 2 * j))

    scratch = [pltpu.VMEM((rt, 1), jnp.float32) for _ in range(5)]
    if use_cache:
        scratch += [pltpu.VMEM((nv, rt, vt), jnp.float32) for _ in range(2)]

    kernel = functools.partial(
        _fused_linear_jsd_kernel, beta=float(beta),
        temperature=float(temperature), vt=vt, valid_v=V, v_pad=V_pad,
        use_cache=use_cache)

    row_losses = pl.pallas_call(
        kernel,
        out_shape=jax.ShapeDtypeStruct((BT_pad, 1), jnp.float32),
        grid_spec=pltpu.PrefetchScalarGridSpec(
            num_scalar_prefetch=0,
            grid=(BT_pad // rt, 2, nv),
            in_specs=[
                pl.BlockSpec((rt, Hs), lambda i, p, j: (i, 0)),    # student x
                pl.BlockSpec((rt, H), lambda i, p, j: (i, 0)),     # teacher x
                pl.BlockSpec((Hs, vt), w_map),                     # Ws^T tile
                pl.BlockSpec((H, vt), w_map),                      # Wt^T tile
            ],
            out_specs=pl.BlockSpec((rt, 1), lambda i, p, j: (i, 0)),
            scratch_shapes=scratch,
        ),
        compiler_params=pltpu.CompilerParams(
            dimension_semantics=("parallel", "arbitrary", "arbitrary"),
            vmem_limit_bytes=vmem_limit),
    )(student_input, teacher_input, swt, twt)

    row = row_losses[:BT, 0]
    if label is None:
        return jnp.sum(row) / jnp.asarray(float(BT), jnp.float32)
    keep = label.reshape(-1) != ignore_index
    n = jnp.sum(keep).astype(jnp.float32)
    total = jnp.sum(jnp.where(keep, row, 0.0))
    return jnp.where(n > 0, total / n, jnp.asarray(0.0, jnp.float32))


class LigerLMHeadJSDPallas:
    """JAX/Pallas analogue of LigerLMHeadJSD (forward pass)."""

    def __init__(self, H, V, dtype, key, beta=0.5, ignore_index=-100,
                 temperature=1.0):
        k_s, k_t = jax.random.split(key)
        bound_s = 1.0 / float(H // 2) ** 0.5
        bound_t = 1.0 / float(H) ** 0.5
        # nn.Linear-style init: uniform(-1/sqrt(in), 1/sqrt(in))
        self.student_weight = jax.random.uniform(
            k_s, (V, H // 2), jnp.float32, -bound_s, bound_s).astype(dtype)
        self.teacher_weight = jax.random.uniform(
            k_t, (V, H), jnp.float32, -bound_t, bound_t).astype(dtype)
        # Hoisted out of the per-call hot path (perf feedback): the transposed
        # + vocab-padded weights are materialized exactly once, here.
        self.student_weight_t = _prepare_weight_t(self.student_weight)
        self.teacher_weight_t = _prepare_weight_t(self.teacher_weight)
        self.vocab_size = V
        self.beta = beta
        self.ignore_index = ignore_index
        self.temperature = temperature

    def __call__(self, student_input, teacher_input, label=None):
        return fused_linear_jsd(
            student_input, self.student_weight_t, teacher_input,
            self.teacher_weight_t, label, beta=self.beta,
            ignore_index=self.ignore_index, temperature=self.temperature,
            weights_pretransposed=True, vocab_size=self.vocab_size)


def _reference_jsd(student_input, sw, teacher_input, tw, label, beta,
                   ignore_index, temperature):
    s_logits = jnp.dot(student_input, sw.T,
                       preferred_element_type=jnp.float32) / temperature
    t_logits = jnp.dot(teacher_input, tw.T,
                       preferred_element_type=jnp.float32) / temperature
    x = jax.nn.log_softmax(s_logits, axis=-1)
    y = jax.nn.log_softmax(t_logits, axis=-1)
    if beta == 0.0:
        elem = jnp.exp(y) * (y - x)
    elif beta == 1.0:
        elem = jnp.exp(x) * (x - y)
    else:
        q, p = jnp.exp(x), jnp.exp(y)
        m = beta * p + (1.0 - beta) * q
        log_m = jnp.log(m)
        elem = beta * p * (y - log_m) + (1.0 - beta) * q * (x - log_m)
    row = jnp.sum(elem, axis=-1)
    if label is None:
        return jnp.sum(row) / row.shape[0]
    keep = label != ignore_index
    n = jnp.sum(keep)
    return jnp.where(n > 0, jnp.sum(jnp.where(keep, row, 0.0)) / n, 0.0)


if __name__ == "__main__":
    key = jax.random.PRNGKey(0)
    B, T, H, V = 2, 8, 64, 256
    BT = B * T
    dtype = jnp.bfloat16

    k_mod, k_s, k_t, k_l, k_w1, k_w2 = jax.random.split(key, 6)
    model = LigerLMHeadJSDPallas(H, V, dtype, k_mod, beta=0.5,
                                 ignore_index=-100, temperature=1.0)

    # fused linear JSD consumes pre-flattened (B*T, hidden) activations
    student_input = jax.random.normal(k_s, (BT, H // 2), jnp.float32).astype(dtype)
    teacher_input = jax.random.normal(k_t, (BT, H), jnp.float32).astype(dtype)

    def check(got, want, name):
        got, want = float(got), float(want)
        assert jnp.isfinite(got), (name, got)
        assert abs(got - want) <= 1e-3 + 2e-2 * abs(want), (name, got, want)

    # case 1: no labels (mean over all rows); logit-cache path
    loss = jax.block_until_ready(model(student_input, teacher_input))
    ref = _reference_jsd(student_input, model.student_weight, teacher_input,
                         model.teacher_weight, None, 0.5, -100, 1.0)
    check(loss, ref, "no_label")

    # case 2: labels with ignored rows
    label = jax.random.randint(k_l, (BT,), 0, V, dtype=jnp.int32)
    label = label.at[1].set(-100).at[7].set(-100)
    loss_l = jax.block_until_ready(model(student_input, teacher_input, label))
    ref_l = _reference_jsd(student_input, model.student_weight, teacher_input,
                           model.teacher_weight, label, 0.5, -100, 1.0)
    check(loss_l, ref_l, "label")

    # case 3: vocab not a multiple of 128 (pad + mask), temperature != 1,
    # generic beta, forced weight-recompute (no logit cache) path
    V2 = 250
    bound_s = 1.0 / float(H // 2) ** 0.5
    bound_t = 1.0 / float(H) ** 0.5
    sw2 = jax.random.uniform(k_w1, (V2, H // 2), jnp.float32,
                             -bound_s, bound_s).astype(dtype)
    tw2 = jax.random.uniform(k_w2, (V2, H), jnp.float32,
                             -bound_t, bound_t).astype(dtype)
    loss2 = jax.block_until_ready(fused_linear_jsd(
        student_input, sw2, teacher_input, tw2, label, beta=0.3,
        ignore_index=-100, temperature=2.0, use_logit_cache=False))
    ref2 = _reference_jsd(student_input, sw2, teacher_input, tw2, label,
                          0.3, -100, 2.0)
    check(loss2, ref2, "padded_vocab_recompute")

    # case 4: beta == 0 (forward KL) static branch, cache path
    loss3 = jax.block_until_ready(fused_linear_jsd(
        student_input, model.student_weight, teacher_input,
        model.teacher_weight, None, beta=0.0, temperature=1.0))
    ref3 = _reference_jsd(student_input, model.student_weight, teacher_input,
                          model.teacher_weight, None, 0.0, -100, 1.0)
    check(loss3, ref3, "beta0")

    print("KERNEL_OK")
</pallas_src>

<mosaic_0001>
module attributes {stable_mosaic.version = 11 : i64} {
  func.func @_fused_linear_jsd_kernel(%arg0: i32, %arg1: i32, %arg2: i32, %arg3: memref<16x32xbf16, #tpu.memory_space<vmem>>, %arg4: memref<16x64xbf16, #tpu.memory_space<vmem>>, %arg5: memref<32x256xbf16, #tpu.memory_space<vmem>>, %arg6: memref<64x256xbf16, #tpu.memory_space<vmem>>, %arg7: memref<16x1xf32, #tpu.memory_space<vmem>>, %arg8: memref<16x1xf32, #tpu.memory_space<vmem>>, %arg9: memref<16x1xf32, #tpu.memory_space<vmem>>, %arg10: memref<16x1xf32, #tpu.memory_space<vmem>>, %arg11: memref<16x1xf32, #tpu.memory_space<vmem>>, %arg12: memref<16x1xf32, #tpu.memory_space<vmem>>, %arg13: memref<1x16x256xf32, #tpu.memory_space<vmem>>, %arg14: memref<1x16x256xf32, #tpu.memory_space<vmem>>) attributes {dimension_semantics = [#tpu.dimension_semantics<parallel>, #tpu.dimension_semantics<arbitrary>, #tpu.dimension_semantics<arbitrary>], iteration_bounds = array<i64: 1, 2, 1>, scalar_prefetch = 0 : i64, scratch_operands = 7 : i64, tpu.core_type = #tpu.core_type<tc>, window_params = [{transform_indices = @transform_0, window_bounds = array<i64: 16, 32>}, {transform_indices = @transform_1, window_bounds = array<i64: 16, 64>}, {transform_indices = @transform_2, window_bounds = array<i64: 32, 256>}, {transform_indices = @transform_3, window_bounds = array<i64: 64, 256>}, {transform_indices = @transform_4, window_bounds = array<i64: 16, 1>}]} {
    %c0_i32 = arith.constant 0 : i32
    %0 = arith.cmpi eq, %arg1, %c0_i32 : i32
    %c0_i32_0 = arith.constant 0 : i32
    %1 = arith.cmpi eq, %arg2, %c0_i32_0 : i32
    %2 = arith.andi %0, %1 : i1
    %3 = arith.extui %2 : i1 to i32
    %c0_i32_1 = arith.constant 0 : i32
    %4 = arith.cmpi ne, %3, %c0_i32_1 : i32
    scf.if %4 {
      %cst = arith.constant 0xFF800000 : f32
      %21 = vector.broadcast %cst : f32 to vector<16x1xf32>
      %c0 = arith.constant 0 : index
      %c0_11 = arith.constant 0 : index
      %22 = vector.load %arg8[%c0, %c0_11] : memref<16x1xf32, #tpu.memory_space<vmem>>, vector<16x1xf32>
      tpu.vector_store %arg8[%c0, %c0_11], %21 {strides = array<i32>} : memref<16x1xf32, #tpu.memory_space<vmem>>, vector<16x1xf32>,
      %cst_12 = arith.constant 0xFF800000 : f32
      %23 = vector.broadcast %cst_12 : f32 to vector<16x1xf32>
      %c0_13 = arith.constant 0 : index
      %c0_14 = arith.constant 0 : index
      %24 = vector.load %arg10[%c0_13, %c0_14] : memref<16x1xf32, #tpu.memory_space<vmem>>, vector<16x1xf32>
      tpu.vector_store %arg10[%c0_13, %c0_14], %23 {strides = array<i32>} : memref<16x1xf32, #tpu.memory_space<vmem>>, vector<16x1xf32>,
      %cst_15 = arith.constant 0.000000e+00 : f32
      %25 = vector.broadcast %cst_15 : f32 to vector<16x1xf32>
      %c0_16 = arith.constant 0 : index
      %c0_17 = arith.constant 0 : index
      %26 = vector.load %arg9[%c0_16, %c0_17] : memref<16x1xf32, #tpu.memory_space<vmem>>, vector<16x1xf32>
      tpu.vector_store %arg9[%c0_16, %c0_17], %25 {strides = array<i32>} : memref<16x1xf32, #tpu.memory_space<vmem>>, vector<16x1xf32>,
      %cst_18 = arith.constant 0.000000e+00 : f32
      %27 = vector.broadcast %cst_18 : f32 to vector<16x1xf32>
      %c0_19 = arith.constant 0 : index
      %c0_20 = arith.constant 0 : index
      %28 = vector.load %arg11[%c0_19, %c0_20] : memref<16x1xf32, #tpu.memory_space<vmem>>, vector<16x1xf32>
      tpu.vector_store %arg11[%c0_19, %c0_20], %27 {strides = array<i32>} : memref<16x1xf32, #tpu.memory_space<vmem>>, vector<16x1xf32>,
      %cst_21 = arith.constant 0.000000e+00 : f32
      %29 = vector.broadcast %cst_21 : f32 to vector<16x1xf32>
      %c0_22 = arith.constant 0 : index
      %c0_23 = arith.constant 0 : index
      %30 = vector.load %arg12[%c0_22, %c0_23] : memref<16x1xf32, #tpu.memory_space<vmem>>, vector<16x1xf32>
      tpu.vector_store %arg12[%c0_22, %c0_23], %29 {strides = array<i32>} : memref<16x1xf32, #tpu.memory_space<vmem>>, vector<16x1xf32>,
    } else {
    }
    %c1_i32 = arith.constant 1 : i32
    %5 = arith.cmpi eq, %arg1, %c1_i32 : i32
    %c0_i32_2 = arith.constant 0 : i32
    %6 = arith.cmpi eq, %arg2, %c0_i32_2 : i32
    %7 = arith.andi %5, %6 : i1
    %8 = arith.extui %7 : i1 to i32
    %c0_i32_3 = arith.constant 0 : i32
    %9 = arith.cmpi ne, %8, %c0_i32_3 : i32
    scf.if %9 {
      %c0 = arith.constant 0 : index
      %c0_11 = arith.constant 0 : index
      %21 = vector.load %arg8[%c0, %c0_11] : memref<16x1xf32, #tpu.memory_space<vmem>>, vector<16x1xf32>
      %c0_12 = arith.constant 0 : index
      %c0_13 = arith.constant 0 : index
      %22 = vector.load %arg9[%c0_12, %c0_13] : memref<16x1xf32, #tpu.memory_space<vmem>>, vector<16x1xf32>
      %23 = math.log %22 : vector<16x1xf32>
      %24 = arith.addf %21, %23 : vector<16x1xf32>
      %c0_14 = arith.constant 0 : index
      %c0_15 = arith.constant 0 : index
      %25 = vector.load %arg8[%c0_14, %c0_15] : memref<16x1xf32, #tpu.memory_space<vmem>>, vector<16x1xf32>
      tpu.vector_store %arg8[%c0_14, %c0_15], %24 {strides = array<i32>} : memref<16x1xf32, #tpu.memory_space<vmem>>, vector<16x1xf32>,
      %c0_16 = arith.constant 0 : index
      %c0_17 = arith.constant 0 : index
      %26 = vector.load %arg10[%c0_16, %c0_17] : memref<16x1xf32, #tpu.memory_space<vmem>>, vector<16x1xf32>
      %c0_18 = arith.constant 0 : index
      %c0_19 = arith.constant 0 : index
      %27 = vector.load %arg11[%c0_18, %c0_19] : memref<16x1xf32, #tpu.memory_space<vmem>>, vector<16x1xf32>
      %28 = math.log %27 : vector<16x1xf32>
      %29 = arith.addf %26, %28 : vector<16x1xf32>
      %c0_20 = arith.constant 0 : index
      %c0_21 = arith.constant 0 : index
      %30 = vector.load %arg10[%c0_20, %c0_21] : memref<16x1xf32, #tpu.memory_space<vmem>>, vector<16x1xf32>
      tpu.vector_store %arg10[%c0_20, %c0_21], %29 {strides = array<i32>} : memref<16x1xf32, #tpu.memory_space<vmem>>, vector<16x1xf32>,
    } else {
    }
    %c0_i32_4 = arith.constant 0 : i32
    %10 = arith.cmpi eq, %arg1, %c0_i32_4 : i32
    %11 = arith.extui %10 : i1 to i32
    %c0_i32_5 = arith.constant 0 : i32
    %12 = arith.cmpi ne, %11, %c0_i32_5 : i32
    scf.if %12 {
      %c0 = arith.constant 0 : index
      %c0_11 = arith.constant 0 : index
      %21 = vector.load %arg3[%c0, %c0_11] : memref<16x32xbf16, #tpu.memory_space<vmem>>, vector<16x32xbf16>
      %c0_12 = arith.constant 0 : index
      %c0_13 = arith.constant 0 : index
      %22 = vector.load %arg4[%c0_12, %c0_13] : memref<16x64xbf16, #tpu.memory_space<vmem>>, vector<16x64xbf16>
      %c0_14 = arith.constant 0 : index
      %c0_15 = arith.constant 0 : index
      %23 = vector.load %arg5[%c0_14, %c0_15] : memref<32x256xbf16, #tpu.memory_space<vmem>>, vector<32x256xbf16>
      %cst = arith.constant dense<0.000000e+00> : vector<16x256xf32>
      %24 = tpu.matmul %21, %23, %cst {dimension_numbers = #tpu.dot_dimension_numbers<[1], [0], [0], [1], [0, 0, 1, 1], [], []>} : vector<16x32xbf16>, vector<32x256xbf16>, vector<16x256xf32> -> vector<16x256xf32>
      %c0_16 = arith.constant 0 : index
      %c0_17 = arith.constant 0 : index
      %25 = vector.load %arg6[%c0_16, %c0_17] : memref<64x256xbf16, #tpu.memory_space<vmem>>, vector<64x256xbf16>
      %cst_18 = arith.constant dense<0.000000e+00> : vector<16x256xf32>
      %26 = tpu.matmul %22, %25, %cst_18 {dimension_numbers = #tpu.dot_dimension_numbers<[1], [0], [0], [1], [0, 0, 1, 1], [], []>} : vector<16x64xbf16>, vector<64x256xbf16>, vector<16x256xf32> -> vector<16x256xf32>
      %27 = arith.index_cast %arg2 : i32 to index
      %c0_19 = arith.constant 0 : index
      %c0_20 = arith.constant 0 : index
      %28 = vector.load %arg13[%27, %c0_19, %c0_20] : memref<1x16x256xf32, #tpu.memory_space<vmem>>, vector<1x16x256xf32>
      %29 = vector.shape_cast %28 : vector<1x16x256xf32> to vector<16x256xf32>
      %30 = vector.shape_cast %24 : vector<16x256xf32> to vector<1x16x256xf32>
      tpu.vector_store %arg13[%27, %c0_19, %c0_20], %30 {strides = array<i32>} : memref<1x16x256xf32, #tpu.memory_space<vmem>>, vector<1x16x256xf32>,
      %31 = arith.index_cast %arg2 : i32 to index
      %c0_21 = arith.constant 0 : index
      %c0_22 = arith.constant 0 : index
      %32 = vector.load %arg14[%31, %c0_21, %c0_22] : memref<1x16x256xf32, #tpu.memory_space<vmem>>, vector<1x16x256xf32>
      %33 = vector.shape_cast %32 : vector<1x16x256xf32> to vector<16x256xf32>
      %34 = vector.shape_cast %26 : vector<16x256xf32> to vector<1x16x256xf32>
      tpu.vector_store %arg14[%31, %c0_21, %c0_22], %34 {strides = array<i32>} : memref<1x16x256xf32, #tpu.memory_space<vmem>>, vector<1x16x256xf32>,
      %c0_23 = arith.constant 0 : index
      %c0_24 = arith.constant 0 : index
      %35 = vector.load %arg8[%c0_23, %c0_24] : memref<16x1xf32, #tpu.memory_space<vmem>>, vector<16x1xf32>
      %cst_25 = arith.constant dense<0xFF800000> : vector<16xf32>
      %36 = vector.multi_reduction <maximumf>, %24, %cst_25 [1] : vector<16x256xf32> to vector<16xf32>
      %37 = vector.shape_cast %36 : vector<16xf32> to vector<16x1xf32>
      %38 = arith.maximumf %35, %37 : vector<16x1xf32>
      %c0_26 = arith.constant 0 : index
      %c0_27 = arith.constant 0 : index
      %39 = vector.load %arg9[%c0_26, %c0_27] : memref<16x1xf32, #tpu.memory_space<vmem>>, vector<16x1xf32>
      %c0_28 = arith.constant 0 : index
      %c0_29 = arith.constant 0 : index
      %40 = vector.load %arg8[%c0_28, %c0_29] : memref<16x1xf32, #tpu.memory_space<vmem>>, vector<16x1xf32>
      %41 = arith.subf %40, %38 : vector<16x1xf32>
      %42 = math.exp %41 : vector<16x1xf32>
      %43 = arith.mulf %39, %42 : vector<16x1xf32>
      %44 = vector.broadcast %38 : vector<16x1xf32> to vector<16x256xf32>
      %45 = arith.subf %24, %44 : vector<16x256xf32>
      %46 = math.exp %45 : vector<16x256xf32>
      %cst_30 = arith.constant dense<0.000000e+00> : vector<16xf32>
      %47 = vector.multi_reduction <add>, %46, %cst_30 [1] : vector<16x256xf32> to vector<16xf32>
      %48 = vector.shape_cast %47 : vector<16xf32> to vector<16x1xf32>
      %49 = arith.addf %43, %48 : vector<16x1xf32>
      %c0_31 = arith.constant 0 : index
      %c0_32 = arith.constant 0 : index
      %50 = vector.load %arg9[%c0_31, %c0_32] : memref<16x1xf32, #tpu.memory_space<vmem>>, vector<16x1xf32>
      tpu.vector_store %arg9[%c0_31, %c0_32], %49 {strides = array<i32>} : memref<16x1xf32, #tpu.memory_space<vmem>>, vector<16x1xf32>,
      %c0_33 = arith.constant 0 : index
      %c0_34 = arith.constant 0 : index
      %51 = vector.load %arg8[%c0_33, %c0_34] : memref<16x1xf32, #tpu.memory_space<vmem>>, vector<16x1xf32>
      tpu.vector_store %arg8[%c0_33, %c0_34], %38 {strides = array<i32>} : memref<16x1xf32, #tpu.memory_space<vmem>>, vector<16x1xf32>,
      %c0_35 = arith.constant 0 : index
      %c0_36 = arith.constant 0 : index
      %52 = vector.load %arg10[%c0_35, %c0_36] : memref<16x1xf32, #tpu.memory_space<vmem>>, vector<16x1xf32>
      %cst_37 = arith.constant dense<0xFF800000> : vector<16xf32>
      %53 = vector.multi_reduction <maximumf>, %26, %cst_37 [1] : vector<16x256xf32> to vector<16xf32>
      %54 = vector.shape_cast %53 : vector<16xf32> to vector<16x1xf32>
      %55 = arith.maximumf %52, %54 : vector<16x1xf32>
      %c0_38 = arith.constant 0 : index
      %c0_39 = arith.constant 0 : index
      %56 = vector.load %arg11[%c0_38, %c0_39] : memref<16x1xf32, #tpu.memory_space<vmem>>, vector<16x1xf32>
      %c0_40 = arith.constant 0 : index
      %c0_41 = arith.constant 0 : index
      %57 = vector.load %arg10[%c0_40, %c0_41] : memref<16x1xf32, #tpu.memory_space<vmem>>, vector<16x1xf32>
      %58 = arith.subf %57, %55 : vector<16x1xf32>
      %59 = math.exp %58 : vector<16x1xf32>
      %60 = arith.mulf %56, %59 : vector<16x1xf32>
      %61 = vector.broadcast %55 : vector<16x1xf32> to vector<16x256xf32>
      %62 = arith.subf %26, %61 : vector<16x256xf32>
      %63 = math.exp %62 : vector<16x256xf32>
      %cst_42 = arith.constant dense<0.000000e+00> : vector<16xf32>
      %64 = vector.multi_reduction <add>, %63, %cst_42 [1] : vector<16x256xf32> to vector<16xf32>
      %65 = vector.shape_cast %64 : vector<16xf32> to vector<16x1xf32>
      %66 = arith.addf %60, %65 : vector<16x1xf32>
      %c0_43 = arith.constant 0 : index
      %c0_44 = arith.constant 0 : index
      %67 = vector.load %arg11[%c0_43, %c0_44] : memref<16x1xf32, #tpu.memory_space<vmem>>, vector<16x1xf32>
      tpu.vector_store %arg11[%c0_43, %c0_44], %66 {strides = array<i32>} : memref<16x1xf32, #tpu.memory_space<vmem>>, vector<16x1xf32>,
      %c0_45 = arith.constant 0 : index
      %c0_46 = arith.constant 0 : index
      %68 = vector.load %arg10[%c0_45, %c0_46] : memref<16x1xf32, #tpu.memory_space<vmem>>, vector<16x1xf32>
      tpu.vector_store %arg10[%c0_45, %c0_46], %55 {strides = array<i32>} : memref<16x1xf32, #tpu.memory_space<vmem>>, vector<16x1xf32>,
    } else {
    }
    %c1_i32_6 = arith.constant 1 : i32
    %13 = arith.cmpi eq, %arg1, %c1_i32_6 : i32
    %14 = arith.extui %13 : i1 to i32
    %c0_i32_7 = arith.constant 0 : i32
    %15 = arith.cmpi ne, %14, %c0_i32_7 : i32
    scf.if %15 {
      %21 = arith.index_cast %arg2 : i32 to index
      %c0 = arith.constant 0 : index
      %c0_11 = arith.constant 0 : index
      %22 = vector.load %arg13[%21, %c0, %c0_11] : memref<1x16x256xf32, #tpu.memory_space<vmem>>, vector<1x16x256xf32>
      %23 = vector.shape_cast %22 : vector<1x16x256xf32> to vector<16x256xf32>
      %24 = arith.index_cast %arg2 : i32 to index
      %c0_12 = arith.constant 0 : index
      %c0_13 = arith.constant 0 : index
      %25 = vector.load %arg14[%24, %c0_12, %c0_13] : memref<1x16x256xf32, #tpu.memory_space<vmem>>, vector<1x16x256xf32>
      %26 = vector.shape_cast %25 : vector<1x16x256xf32> to vector<16x256xf32>
      %c0_14 = arith.constant 0 : index
      %c0_15 = arith.constant 0 : index
      %27 = vector.load %arg8[%c0_14, %c0_15] : memref<16x1xf32, #tpu.memory_space<vmem>>, vector<16x1xf32>
      %28 = vector.broadcast %27 : vector<16x1xf32> to vector<16x256xf32>
      %29 = arith.subf %23, %28 : vector<16x256xf32>
      %c0_16 = arith.constant 0 : index
      %c0_17 = arith.constant 0 : index
      %30 = vector.load %arg10[%c0_16, %c0_17] : memref<16x1xf32, #tpu.memory_space<vmem>>, vector<16x1xf32>
      %31 = vector.broadcast %30 : vector<16x1xf32> to vector<16x256xf32>
      %32 = arith.subf %26, %31 : vector<16x256xf32>
      %33 = math.exp %29 : vector<16x256xf32>
      %34 = math.exp %32 : vector<16x256xf32>
      %cst = arith.constant 5.000000e-01 : f32
      %35 = vector.broadcast %cst : f32 to vector<16x256xf32>
      %36 = arith.mulf %35, %34 : vector<16x256xf32>
      %cst_18 = arith.constant 5.000000e-01 : f32
      %37 = vector.broadcast %cst_18 : f32 to vector<16x256xf32>
      %38 = arith.mulf %37, %33 : vector<16x256xf32>
      %39 = arith.addf %36, %38 : vector<16x256xf32>
      %cst_19 = arith.constant 1.17549435E-38 : f32
      %40 = vector.broadcast %cst_19 : f32 to vector<16x256xf32>
      %41 = arith.maximumf %39, %40 : vector<16x256xf32>
      %42 = math.log %41 : vector<16x256xf32>
      %cst_20 = arith.constant 5.000000e-01 : f32
      %43 = vector.broadcast %cst_20 : f32 to vector<16x256xf32>
      %44 = arith.mulf %43, %34 : vector<16x256xf32>
      %45 = arith.subf %32, %42 : vector<16x256xf32>
      %46 = arith.mulf %44, %45 : vector<16x256xf32>
      %cst_21 = arith.constant 5.000000e-01 : f32
      %47 = vector.broadcast %cst_21 : f32 to vector<16x256xf32>
      %48 = arith.mulf %47, %33 : vector<16x256xf32>
      %49 = arith.subf %29, %42 : vector<16x256xf32>
      %50 = arith.mulf %48, %49 : vector<16x256xf32>
      %51 = arith.addf %46, %50 : vector<16x256xf32>
      %c0_22 = arith.constant 0 : index
      %c0_23 = arith.constant 0 : index
      %52 = vector.load %arg12[%c0_22, %c0_23] : memref<16x1xf32, #tpu.memory_space<vmem>>, vector<16x1xf32>
      %cst_24 = arith.constant dense<0.000000e+00> : vector<16xf32>
      %53 = vector.multi_reduction <add>, %51, %cst_24 [1] : vector<16x256xf32> to vector<16xf32>
      %54 = vector.shape_cast %53 : vector<16xf32> to vector<16x1xf32>
      %55 = arith.addf %52, %54 : vector<16x1xf32>
      %c0_25 = arith.constant 0 : index
      %c0_26 = arith.constant 0 : index
      %56 = vector.load %arg12[%c0_25, %c0_26] : memref<16x1xf32, #tpu.memory_space<vmem>>, vector<16x1xf32>
      tpu.vector_store %arg12[%c0_25, %c0_26], %55 {strides = array<i32>} : memref<16x1xf32, #tpu.memory_space<vmem>>, vector<16x1xf32>,
    } else {
    }
    %c1_i32_8 = arith.constant 1 : i32
    %16 = arith.cmpi eq, %arg1, %c1_i32_8 : i32
    %c0_i32_9 = arith.constant 0 : i32
    %17 = arith.cmpi eq, %arg2, %c0_i32_9 : i32
    %18 = arith.andi %16, %17 : i1
    %19 = arith.extui %18 : i1 to i32
    %c0_i32_10 = arith.constant 0 : i32
    %20 = arith.cmpi ne, %19, %c0_i32_10 : i32
    scf.if %20 {
      %c0 = arith.constant 0 : index
      %c0_11 = arith.constant 0 : index
      %21 = vector.load %arg12[%c0, %c0_11] : memref<16x1xf32, #tpu.memory_space<vmem>>, vector<16x1xf32>
      %c0_12 = arith.constant 0 : index
      %c0_13 = arith.constant 0 : index
      %22 = vector.load %arg7[%c0_12, %c0_13] : memref<16x1xf32, #tpu.memory_space<vmem>>, vector<16x1xf32>
      tpu.vector_store %arg7[%c0_12, %c0_13], %21 {strides = array<i32>} : memref<16x1xf32, #tpu.memory_space<vmem>>, vector<16x1xf32>,
    } else {
    }
    return
  }
  func.func @transform_0(%arg0: i32, %arg1: i32, %arg2: i32) -> (i32, i32) {
    %c0_i32 = arith.constant 0 : i32
    %c0_i32_0 = arith.constant 0 : i32
    return %arg0, %c0_i32 : i32, i32
  }
  func.func @transform_1(%arg0: i32, %arg1: i32, %arg2: i32) -> (i32, i32) {
    %c0_i32 = arith.constant 0 : i32
    %c0_i32_0 = arith.constant 0 : i32
    return %arg0, %c0_i32 : i32, i32
  }
  func.func @transform_2(%arg0: i32, %arg1: i32, %arg2: i32) -> (i32, i32) {
    %c1_i32 = arith.constant 1 : i32
    %0 = arith.subi %c1_i32, %arg1 : i32
    %1 = arith.muli %arg2, %0 : i32
    %c0_i32 = arith.constant 0 : i32
    %2 = arith.muli %c0_i32, %arg1 : i32
    %3 = arith.addi %1, %2 : i32
    %c0_i32_0 = arith.constant 0 : i32
    %c0_i32_1 = arith.constant 0 : i32
    return %c0_i32_0, %3 : i32, i32
  }
  func.func @transform_3(%arg0: i32, %arg1: i32, %arg2: i32) -> (i32, i32) {
    %c1_i32 = arith.constant 1 : i32
    %0 = arith.subi %c1_i32, %arg1 : i32
    %1 = arith.muli %arg2, %0 : i32
    %c0_i32 = arith.constant 0 : i32
    %2 = arith.muli %c0_i32, %arg1 : i32
    %3 = arith.addi %1, %2 : i32
    %c0_i32_0 = arith.constant 0 : i32
    %c0_i32_1 = arith.constant 0 : i32
    return %c0_i32_0, %3 : i32, i32
  }
  func.func @transform_4(%arg0: i32, %arg1: i32, %arg2: i32) -> (i32, i32) {
    %c0_i32 = arith.constant 0 : i32
    %c0_i32_0 = arith.constant 0 : i32
    return %arg0, %c0_i32 : i32, i32
  }
}

</mosaic_0001>

<bundles_post_ra>
// kernel: tpu_custom_call.1
= control target key start
LH: loop header
LB: loop body
LE: loop exit
PB: predicated region body
PF: predicated region fallthrough
CT: control target
= control target key end

     0   :  { %9 = vsyncpa [#allocation10], 0  ;;  %s1554_s0 = inlined_call_operand.hbm [shape: bf16[16,32], index: 0, kind: input, shape index: {}]   ;;  %s1555_s1 = inlined_call_operand.hbm [shape: bf16[16,64], index: 1, kind: input, shape index: {}]   ;;  %s1556_s2 = inlined_call_operand.hbm [shape: bf16[32,256], index: 2, kind: input, shape index: {}]   ;;  %s1557_s3 = inlined_call_operand.hbm [shape: bf16[64,256], index: 3, kind: input, shape index: {}]   ;;  %s1558_s4 = inlined_call_operand.vmem [shape: f32[16,1], index: 4, kind: output, shape index: {}]  }
   0x1   :  { %10 = vsyncpa [#allocation12], 0  ;;  %s1349_s15 = smov 0   ;;  %s1351_s16 = smov 0  }
   0x2   :  { %s1353_s17 = smov 0  }
   0x3 LB: > { %s924_s18 = sadd.s32 4294967295, %s1310_s17   ;;  %s31_s19 = sadd.s32 1, %s1306_s16  ;;  %s1310_s17 = sphi %s1353_s17, %s16_s17   ;;  %s1306_s16 = sphi %s1351_s16, %s1564_s16   ;;  %s1302_s15 = sphi %s1349_s15, %s1563_s15  }
   0x4   : > { %p33_p0 = scmp.ge.s32.totalorder %s31_s19, 2  ;;  %p925_p1 = scmp.ge.s32.totalorder %s1310_s17, 1 }
   0x5   : > { %p178_p2 = scmp.lt.s32.totalorder %s1310_s17, 3  ;;  %p1376_p4 = scmp.eq.s32.totalorder %s924_s18, 0 }
   0x6   : > { %s1566_s19 = smov (%p33_p0, %s31_s19), 0  ;;  %s192_s24 = sshll.u32 %s1554_s0, 4  ;;  %s193_s24 = int_to_ptr.hbm [resolvable:$true] %s192_s24 }
   0x7   : > { %p1370_p3 = pnand %p925_p1, %p178_p2  ;;  %s1312_s25 = smov [#allocation9]  }
   0x8   : > { %s194_s26 = sshll.u32 %s1312_s25, 4  ;;  %s1313_s28 = smov 64   ;;  %s195_s26 = int_to_ptr.vmem [resolvable:$true] %s194_s26 }
   0x9   : > { %p1036_p5 = pneg %p1370_p3  ;;  %s1314_s29 = smov 4  }
   0xa   : > { %p1052_p7 = scmp.lt.s32.totalorder %s1310_s17, 2  ;;  %p1053_p8 = scmp.eq.s32.totalorder %s1310_s17, 0 }
   0xb   : > { %p1387_p6 = pnand %p1376_p4, %p1036_p5  ;;  %s225_s30 = sand.u32 1, %s1310_s17  }
   0xc   : > { %s237_s7 = sshll.u32 %s1556_s2, 4  ;;  %p1399_p9 = pnand %p1053_p8, %p1052_p7  ;;  %s238_s7 = int_to_ptr.hbm [resolvable:$true] %s237_s7 }
   0xd   : > { %1039 = dma.hbm_to_vmem [thread:$0]  (!%p1387_p6), %s193_s24, 128, %s195_s26, [#allocation10], %s1313_s28, %s1313_s28, %s1314_s29  }
   0xe   : > { %s1315_s9 = smov [#allocation13]   ;;  %s209_s13 = sshll.u32 %s1555_s1, 4  ;;  %s210_s13 = int_to_ptr.hbm [resolvable:$true] %s209_s13 }
   0xf   : > { %s239_s10 = sshll.u32 %s1315_s9, 4  ;;  %s226_s14 = scalar_lea.sflag [#allocation10], %s225_s30  ;;  %s240_s10 = int_to_ptr.vmem [resolvable:$true] %s239_s10 }
  0x10   : > { %s1316_s22 = smov 128   ;;  %s1317_s23 = smov 8  }
  0x11   : > { %1046 = dma.hbm_to_vmem [thread:$0]  (!%p1399_p9), %s238_s7, 512, %s240_s10, %s226_s14, %s1316_s22, %s1316_s22, %s1317_s23  }
  0x12   : > { %s1318_s24 = smov [#allocation11]   ;;  %s261_s6 = sshll.u32 %s1557_s3, 4  ;;  %s262_s6 = int_to_ptr.hbm [resolvable:$true] %s261_s6 }
  0x13   : > { %s211_s25 = sshll.u32 %s1318_s24, 4  ;;  %s1319_s9 = smov [#allocation14]   ;;  %s212_s25 = int_to_ptr.vmem [resolvable:$true] %s211_s25 }
  0x14   : > { %1042 = dma.hbm_to_vmem [thread:$0]  (!%p1387_p6), %s210_s13, 128, %s212_s25, [#allocation12], %s1313_s28, %s1313_s28, %s1314_s29  }
  0x15   : > { %s263_s11 = sshll.u32 %s1319_s9, 4  ;;  %275 = sbr.rel (%p1370_p3) target bundleno = 897 (0x381), region = 36  ;;  %s264_s11 = int_to_ptr.vmem [resolvable:$true] %s263_s11 }
  0x16   : > { %1049 = dma.hbm_to_vmem [thread:$0]  (!%p1399_p9), %s262_s6, 1024, %s264_s11, %s226_s14, %s1316_s22, %s1316_s22, %s1317_s23  }
  0x1a   : > { %1289 = dma.done.wait (%p1376_p4), [#allocation10], 128  }
  0x1b   : > { %1291 = vsyncadd (%p1376_p4), [#allocation10], 4294967168 }
  0x1c   : > { %1293 = dma.done.wait (%p1376_p4), [#allocation12], 128  }
  0x1d   : > { %1295 = vsyncadd (%p1376_p4), [#allocation12], 4294967168  ;;  %s287_s27 = sand.u32 1, %s924_s18  }
  0x1e   : > { %s288_s28 = scalar_lea.sflag [#allocation10], %s287_s27 }
  0x1f   : > { %1297 = dma.done.wait (%p1376_p4), %s288_s28, 1536  }
  0x20   : > { %1299 = vsyncadd (%p1376_p4), %s288_s28, 4294965760  ;;  %p347_p10 = scmp.eq.s32.totalorder %s1302_s15, 0 }
  0x21   : > { %vm353_vm0 = vcmask (%p347_p10), 7168   ;;  %v1320_v0 = vmov (%p347_p10), -inf   ;;  %v1321_v1 = vmov (%p347_p10), 0.0  }
  0x22   : > { %352 = sbr.rel (!%p347_p10) target bundleno = 44 (0x2c), region = 56  ;;  %354 = vst.msk [vmem:[#allocation2] sm:$0xff] (%p347_p10), %vm353_vm0, %v1320_v0 }
  0x23   : > { %355 = vst.msk [vmem:[#allocation2 + $0x8] sm:$0xff] (%p347_p10), %vm353_vm0, %v1320_v0 }
  0x24   : > { %356 = vst.msk [vmem:[#allocation4] sm:$0xff] (%p347_p10), %vm353_vm0, %v1320_v0 }
  0x25   : > { %357 = vst.msk [vmem:[#allocation4 + $0x8] sm:$0xff] (%p347_p10), %vm353_vm0, %v1320_v0 }
  0x26   : > { %358 = vst.msk [vmem:[#allocation3] sm:$0xff] (%p347_p10), %vm353_vm0, %v1321_v1 }
  0x27   : > { %359 = vst.msk [vmem:[#allocation3 + $0x8] sm:$0xff] %vm353_vm0, %v1321_v1 }
  0x28   : > { %360 = vst.msk [vmem:[#allocation5] sm:$0xff] %vm353_vm0, %v1321_v1 }
  0x29   : > { %361 = vst.msk [vmem:[#allocation5 + $0x8] sm:$0xff] %vm353_vm0, %v1321_v1 }
  0x2a   : > { %362 = vst.msk [vmem:[#allocation6] sm:$0xff] %vm353_vm0, %v1321_v1 }
  0x2b   : > { %363 = vst.msk [vmem:[#allocation6 + $0x8] sm:$0xff] %vm353_vm0, %v1321_v1 }
  0x2c PF: > { %p364_p11 = scmp.eq.s32.totalorder %s1302_s15, 1 }
  0x2d   : > { %vm379_vm1 = vcmask (%p364_p11), 7168  }
  0x2e   : > { %368 = sbr.rel (!%p364_p11) target bundleno = 66 (0x42), region = 60  ;;  %v369_v7 = vld [vmem:[#allocation2] sm:$0xff] (%p364_p11) }
  0x2f   : > { %v384_v4 = vld [vmem:[#allocation5] sm:$0xff] (%p364_p11)  ;;  %v370_v10 = vld [vmem:[#allocation2 + $0x8] sm:$0xff] (%p364_p11) }
  0x30   : > { %v385_v5 = vld [vmem:[#allocation5 + $0x8] sm:$0xff] (%p364_p11)  ;;  %v382_v13 = vld [vmem:[#allocation4] sm:$0xff] (%p364_p11) }
  0x31   : > { %v383_v17 = vld [vmem:[#allocation4 + $0x8] sm:$0xff] (%p364_p11) }
  0x32   : > { %v371_v2 = vld [vmem:[#allocation3] sm:$0xff] (%p364_p11) }
  0x33   : > { %1095 = vlog2.f32 %v371_v2  ;;  %v372_v3 = vld [vmem:[#allocation3 + $0x8] sm:$0xff] }
  0x34   : > { %1097 = vlog2.f32 %v372_v3 }
  0x35   : > { %1099 = vlog2.f32 %v384_v4 }
  0x36   : > { %1101 = vlog2.f32 %v385_v5 }
  0x39   : > { %v1096_v6 = vpop.eup %1095 }
  0x3a   : > { %v1098_v8 = vpop.eup %1097  ;;  %v374_v9 = vmul.f32 0.6931472, %v1096_v6 }
  0x3b   : > { %v1100_v11 = vpop.eup %1099  ;;  %v376_v12 = vmul.f32 0.6931472, %v1098_v8 }
  0x3c   : > { %v1102_v14 = vpop.eup %1101  ;;  %v377_v15 = vadd.f32 %v374_v9, %v369_v7  ;;  %v387_v16 = vmul.f32 0.6931472, %v1100_v11 }
  0x3d   : > { %v378_v18 = vadd.f32 %v376_v12, %v370_v10  ;;  %v389_v19 = vmul.f32 0.6931472, %v1102_v14 }
  0x3e   : > { %380 = vst.msk [vmem:[#allocation2] sm:$0xff] %vm379_vm1, %v377_v15  ;;  %v390_v20 = vadd.f32 %v387_v16, %v382_v13 }
  0x3f   : > { %381 = vst.msk [vmem:[#allocation2 + $0x8] sm:$0xff] %vm379_vm1, %v378_v18  ;;  %v391_v21 = vadd.f32 %v389_v19, %v383_v17 }
  0x40   : > { %392 = vst.msk [vmem:[#allocation4] sm:$0xff] %vm379_vm1, %v390_v20 }
  0x41   : > { %393 = vst.msk [vmem:[#allocation4 + $0x8] sm:$0xff] %vm379_vm1, %v391_v21 }
  0x42 PF: > { %p938_p12 = scmp.ne.s32.totalorder %s1302_s15, 0 }
  0x44   : > { %396 = sbr.rel (%p938_p12) target bundleno = 601 (0x259), region = 64 }
  0x49   : > { %v953_v22 = vld [vmem:[#allocation13 + $0x10] sm:$0xf]  ;;  %v1011_v23 = vld [vmem:[#allocation13 + $0x14] sm:$0xf0]  ;;  %v1010_v24 = vld [vmem:[#allocation13 + $0x14] sm:$0xf] }
  0x4a   : > { %v954_v25 = vor.u32 %v1011_v23, %v953_v22  ;;  %v955_v26 = vld [vmem:[#allocation13 + $0x18] sm:$0xf0]  ;;  %v991_v27 = vld [vmem:[#allocation14 + $0x30] sm:$0xf]  ;;  %v1019_v28 = vld [vmem:[#allocation14 + $0x34] sm:$0xf0] }
  0x4b   : > { %v958_v29 = vor.u32 %v1010_v24, %v955_v26  ;;  %v992_v30 = vor.u32 %v1019_v28, %v991_v27  ;;  %v1018_v31 = vld [vmem:[#allocation14 + $0x34] sm:$0xf]  ;;  %v993_v32 = vld [vmem:[#allocation14 + $0x38] sm:$0xf0]  ;;  %v945_v33 = vld [vmem:[#allocation13] sm:$0xf] }
  0x4c   : > { %440 = vmatpush.bf16.msra.mxu0 %v954_v25  ;;  %v996_v34 = vor.u32 %v1018_v31, %v993_v32  ;;  %v1009_v35 = vld [vmem:[#allocation13 + $0x4] sm:$0xf0]  ;;  %v1008_v36 = vld [vmem:[#allocation13 + $0x4] sm:$0xf]  ;;  %v947_v37 = vld [vmem:[#allocation13 + $0x8] sm:$0xf0] }
  0x4d   : > { %454 = vmatpush.bf16.msra.mxu1 %v958_v29  ;;  %523 = vmatpush.bf16.msra.mxu2 %v992_v30  ;;  %v946_v38 = vor.u32 %v1009_v35, %v945_v33  ;;  %v950_v39 = vor.u32 %v1008_v36, %v947_v37  ;;  %v983_v40 = vld [vmem:[#allocation14 + $0x20] sm:$0xf]  ;;  %v1017_v41 = vld [vmem:[#allocation14 + $0x24] sm:$0xf0]  ;;  %v1016_v42 = vld [vmem:[#allocation14 + $0x24] sm:$0xf] }
  0x4e   : > { %537 = vmatpush.bf16.msra.mxu3 %v996_v34  ;;  %v984_v43 = vor.u32 %v1017_v41, %v983_v40  ;;  %v985_v44 = vld [vmem:[#allocation14 + $0x28] sm:$0xf0]  ;;  %v1006_v45 = vld [vmem:[#allocation9] sm:$0xff]  ;;  %v1015_v48 = vld [vmem:[#allocation14 + $0x14] sm:$0xf0]  ;;  %vm430_vm2 = vcmask 261120  }
  0x4f   : > { %v975_v46 = vld [vmem:[#allocation14 + $0x10] sm:$0xf]  ;;  %v988_v47 = vor.u32 %v1016_v42, %v985_v44  ;;  %v1014_v49 = vld [vmem:[#allocation14 + $0x14] sm:$0xf]  ;;  %v977_v50 = vld [vmem:[#allocation14 + $0x18] sm:$0xf0] }
  0x50   : > { %441 = vmatpush.bf16.msra.mxu0 %v946_v38  ;;  %v976_v51 = vor.u32 %v1015_v48, %v975_v46  ;;  %v980_v52 = vor.u32 %v1014_v49, %v977_v50  ;;  %v967_v53 = vld [vmem:[#allocation14] sm:$0xf]  ;;  %v1013_v54 = vld [vmem:[#allocation14 + $0x4] sm:$0xf0]  ;;  %v1012_v55 = vld [vmem:[#allocation14 + $0x4] sm:$0xf] }
  0x51   : > { %455 = vmatpush.bf16.msra.mxu1 %v950_v39  ;;  %524 = vmatpush.bf16.msra.mxu2 %v984_v43  ;;  %v969_v56 = vld [vmem:[#allocation14 + $0x8] sm:$0xf0]  ;;  %v968_v57 = vor.u32 %v1013_v54, %v967_v53  ;;  %v1007_v59 = vld [vmem:[#allocation11] sm:$0xff]  ;;  %vm515_vm3 = vcmask 523264   ;;  %v1322_v8 = vmov 0   ;;  %v1452_v9 = vld [vmem:[#allocation2] sm:$0xff] }
  0x52   : > { %538 = vmatpush.bf16.msra.mxu3 %v988_v47  ;;  %v972_v58 = vor.u32 %v1012_v55, %v969_v56  ;;  %1103 = vset.pattern.permute.xlu2 %v1322_v8  ;;  %vm610_vm4 = vcmask 7168   ;;  %v1462_v13 = vld [vmem:[#allocation2 + $0x8] sm:$0xff]  ;;  %v1467_v17 = vld [vmem:[#allocation4] sm:$0xff] }
  0x53   : > { %959 = vmatmul.msk.bf16.vlgmr.msra.gmra.mxu0 %vm430_vm2, %v1006_v45  ;;  %1104 = vset.pattern.permute.xlu0 %v1322_v8  ;;  %v1477_v21 = vld [vmem:[#allocation4 + $0x8] sm:$0xff] }
  0x54   : > { %960 = vmatmul.msk.bf16.vlgmr.msra.gmra.mxu1 %vm430_vm2, %v1006_v45  ;;  %1105 = vset.pattern.permute.xlu1 %v1322_v8  ;;  %v625_v8 = vld [vmem:[#allocation5] sm:$0xff] }
  0x55   : > { %525 = vmatpush.bf16.msra.mxu2 %v976_v51 }
  0x56   : > { %539 = vmatpush.bf16.msra.mxu3 %v980_v52 }
  0x59   : > { %526 = vmatpush.bf16.msra.mxu2 %v968_v57 }
  0x5a   : > { %540 = vmatpush.bf16.msra.mxu3 %v972_v58 }
  0x5c   : > { %997 = vmatmul.msk.bf16.vlgmr.msra.gmra.mxu2 %vm515_vm3, %v1007_v59 }
  0x5d   : > { %998 = vmatmul.msk.bf16.vlgmr.msra.gmra.mxu3 %vm515_vm3, %v1007_v59 }
  0xd0   : > { %v443_v60 = vpop.f32.mrf.mxu0 }
  0xd1   : > { %550 = vst [vmem:[#allocation7 + $0x10] sm:$0xff] %v443_v60  ;;  %v457_v61 = vpop.f32.mrf.mxu1 }
  0xd2   : > { %551 = vst [vmem:[#allocation7] sm:$0xff] %v457_v61  ;;  %v562_v62 = vmax.f32 %v443_v60, %v457_v61 }
  0xd4   : > { %563 = vmax.xlane.f32.xlu0 %v562_v62 }
  0xd8   : > { %v445_v63 = vpop.f32.mrf.mxu0 }
  0xd9   : > { %552 = vst [vmem:[#allocation7 + $0x18] sm:$0xff] %v445_v63  ;;  %v459_v0 = vpop.f32.mrf.mxu1 }
  0xda   : > { %553 = vst [vmem:[#allocation7 + $0x8] sm:$0xff] %v459_v0  ;;  %v565_v1 = vmax.f32 %v445_v63, %v459_v0 }
  0xdc   : > { %566 = vmax.xlane.f32.xlu0 %v565_v1  ;;  %v571_v1 = vld [vmem:[#allocation3 + $0x8] sm:$0xff] }
  0xdf   : > { %v1436_v2 = vpop.f32.mrf.mxu2 }
  0xe0   : > { %556 = vst [vmem:[#allocation8] sm:$0xff] %v1436_v2  ;;  %v1439_v3 = vpop.f32.mrf.mxu3 }
  0xe1   : > { %557 = vst [vmem:[#allocation8 + $0x18] sm:$0xff] %v1439_v3  ;;  %v617_v4 = vmax.f32 %v1436_v2, %v1439_v3 }
  0xe3   : > { %618 = vmax.xlane.f32.xlu1 %v617_v4 }
  0xe7   : > { %v1444_v5 = vpop.f32.mrf.mxu2 }
  0xe8   : > { %558 = vst [vmem:[#allocation8 + $0x8] sm:$0xff] %v1444_v5  ;;  %v1447_v6 = vpop.f32.mrf.mxu3 }
  0xe9   : > { %559 = vst [vmem:[#allocation8 + $0x10] sm:$0xff] %v1447_v6  ;;  %v620_v7 = vmax.f32 %v1444_v5, %v1447_v6 }
  0xeb   : > { %621 = vmax.xlane.f32.xlu1 %v620_v7 }
 0x147   : > { %v564_v10 = vpop.xlane.xlu0 %563 }
 0x148   : > { %v1455_v11 = vmax.f32 %v1452_v9, %v564_v10 }
 0x14a   : > { %v572_v12 = vsub.f32 %v1452_v9, %v1455_v11  ;;  %613 = vst.msk [vmem:[#allocation2] sm:$0xff] %vm610_vm4, %v1455_v11  ;;  %582 = vperm.xlu2 %1103, %v1455_v11  }
 0x14c   : > { %v574_v57 = vmul.f32 1.442695, %v572_v12 }
 0x14f   : > { %v567_v14 = vpop.xlane.xlu0 %566 }
 0x150   : > { %v569_v15 = vmax.f32 %v1462_v13, %v567_v14 }
 0x152   : > { %v573_v16 = vsub.f32 %v1462_v13, %v569_v15  ;;  %614 = vst.msk [vmem:[#allocation2 + $0x8] sm:$0xff] %vm610_vm4, %v569_v15  ;;  %587 = vperm.xlu2 %1103, %v569_v15   ;;  %v626_v13 = vld [vmem:[#allocation5 + $0x8] sm:$0xff] }
 0x154   : > { %v576_v58 = vmul.f32 1.442695, %v573_v16 }
 0x156   : > { %v619_v18 = vpop.xlane.xlu1 %618 }
 0x157   : > { %v1470_v19 = vmax.f32 %v1467_v17, %v619_v18 }
 0x159   : > { %v627_v20 = vsub.f32 %v1467_v17, %v1470_v19  ;;  %667 = vst.msk [vmem:[#allocation4] sm:$0xff] %vm610_vm4, %v1470_v19  ;;  %637 = vperm.xlu0 %1104, %v1470_v19  }
 0x15e   : > { %v622_v22 = vpop.xlane.xlu1 %621 }
 0x15f   : > { %v1480_v23 = vmax.f32 %v1477_v21, %v622_v22 }
 0x161   : > { %v628_v24 = vsub.f32 %v1477_v21, %v1480_v23  ;;  %668 = vst.msk [vmem:[#allocation4 + $0x8] sm:$0xff] %vm610_vm4, %v1480_v23  ;;  %642 = vperm.xlu1 %1105, %v1480_v23  }
 0x1a4   : > { %v583_v25 = vpop.permute.xlu2 %582 }
 0x1a5   : > { %v590_v26 = vsub.f32 %v443_v60, %v583_v25  ;;  %v591_v27 = vsub.f32 %v457_v61, %v583_v25  ;;  %v570_v60 = vld [vmem:[#allocation3] sm:$0xff] }
 0x1a7   : > { %v594_v28 = vmul.f32 1.442695, %v590_v26  ;;  %v596_v29 = vmul.f32 1.442695, %v591_v27 }
 0x1a9   : > { %1106 = vpow2.f32 %v594_v28 }
 0x1aa   : > { %1108 = vpow2.f32 %v596_v29 }
 0x1ac   : > { %v588_v30 = vpop.permute.xlu2 %587 }
 0x1ad   : > { %v592_v31 = vsub.f32 %v445_v63, %v588_v30  ;;  %v593_v32 = vsub.f32 %v459_v0, %v588_v30 }
 0x1af   : > { %v1107_v33 = vpop.eup %1106  ;;  %v598_v34 = vmul.f32 1.442695, %v592_v31  ;;  %v600_v35 = vmul.f32 1.442695, %v593_v32 }
 0x1b0   : > { %v1109_v36 = vpop.eup %1108 }
 0x1b1   : > { %1110 = vpow2.f32 %v598_v34  ;;  %v602_v37 = vadd.f32 %v1109_v36, %v1107_v33 }
 0x1b2   : > { %1112 = vpow2.f32 %v600_v35 }
 0x1b3   : > { %603 = vadd.xlane.f32.xlu2 %v602_v37 }
 0x1b7   : > { %v1111_v38 = vpop.eup %1110 }
 0x1b8   : > { %v1113_v39 = vpop.eup %1112 }
 0x1b9   : > { %v605_v40 = vadd.f32 %v1113_v39, %v1111_v38 }
 0x1bb   : > { %606 = vadd.xlane.f32.xlu1 %v605_v40 }
 0x1cb   : > { %v638_v41 = vpop.permute.xlu0 %637 }
 0x1cc   : > { %v645_v42 = vsub.f32 %v1436_v2, %v638_v41  ;;  %v646_v43 = vsub.f32 %v1439_v3, %v638_v41 }
 0x1ce   : > { %v649_v44 = vmul.f32 1.442695, %v645_v42  ;;  %v651_v45 = vmul.f32 1.442695, %v646_v43 }
 0x1d0   : > { %1114 = vpow2.f32 %v649_v44 }
 0x1d1   : > { %1116 = vpow2.f32 %v651_v45 }
 0x1d3   : > { %v643_v46 = vpop.permute.xlu1 %642 }
 0x1d4   : > { %v647_v47 = vsub.f32 %v1444_v5, %v643_v46  ;;  %v648_v48 = vsub.f32 %v1447_v6, %v643_v46  ;;  %v629_v5 = vmul.f32 1.442695, %v627_v20  ;;  %v631_v6 = vmul.f32 1.442695, %v628_v24 }
 0x1d6   : > { %v1115_v49 = vpop.eup %1114  ;;  %v653_v50 = vmul.f32 1.442695, %v647_v47  ;;  %v655_v51 = vmul.f32 1.442695, %v648_v48 }
 0x1d7   : > { %v1117_v52 = vpop.eup %1116 }
 0x1d8   : > { %1118 = vpow2.f32 %v653_v50  ;;  %v657_v53 = vadd.f32 %v1117_v52, %v1115_v49 }
 0x1d9   : > { %1120 = vpow2.f32 %v655_v51 }
 0x1da   : > { %658 = vadd.xlane.f32.xlu0 %v657_v53  ;;  %1122 = vpow2.f32 %v574_v57 }
 0x1db   : > { %1124 = vpow2.f32 %v576_v58 }
 0x1dc   : > { %1126 = vpow2.f32 %v629_v5 }
 0x1dd   : > { %1128 = vpow2.f32 %v631_v6 }
 0x1de   : > { %v1119_v54 = vpop.eup %1118 }
 0x1df   : > { %v1121_v55 = vpop.eup %1120 }
 0x1e0   : > { %v660_v56 = vadd.f32 %v1121_v55, %v1119_v54  ;;  %v1123_v59 = vpop.eup %1122 }
 0x1e1   : > { %v578_v61 = vmul.f32 %v1123_v59, %v570_v60  ;;  %v1125_v0 = vpop.eup %1124 }
 0x1e2   : > { %661 = vadd.xlane.f32.xlu2 %v660_v56  ;;  %v579_v2 = vmul.f32 %v1125_v0, %v571_v1  ;;  %v1127_v7 = vpop.eup %1126 }
 0x1e3   : > { %v633_v9 = vmul.f32 %v1127_v7, %v625_v8  ;;  %v1129_v12 = vpop.eup %1128 }
 0x1e4   : > { %v634_v14 = vmul.f32 %v1129_v12, %v626_v13 }
 0x226   : > { %v604_v62 = vpop.xlane.xlu2 %603 }
 0x227   : > { %v608_v63 = vadd.f32 %v604_v62, %v578_v61 }
 0x229   : > { %611 = vst.msk [vmem:[#allocation3] sm:$0xff] %vm610_vm4, %v608_v63 }
 0x22e   : > { %v607_v3 = vpop.xlane.xlu1 %606 }
 0x22f   : > { %v609_v4 = vadd.f32 %v607_v3, %v579_v2 }
 0x231   : > { %612 = vst.msk [vmem:[#allocation3 + $0x8] sm:$0xff] %vm610_vm4, %v609_v4 }
 0x24d   : > { %v659_v10 = vpop.xlane.xlu0 %658 }
 0x24e   : > { %v663_v11 = vadd.f32 %v659_v10, %v633_v9 }
 0x250   : > { %665 = vst.msk [vmem:[#allocation5] sm:$0xff] %vm610_vm4, %v663_v11 }
 0x255   : > { %v662_v15 = vpop.xlane.xlu2 %661 }
 0x256   : > { %v664_v16 = vadd.f32 %v662_v15, %v634_v14 }
 0x258   : > { %666 = vst.msk [vmem:[#allocation5 + $0x8] sm:$0xff] %vm610_vm4, %v664_v16 }
 0x259 PF: > { %p999_p13 = scmp.ne.s32.totalorder %s1302_s15, 1 }
 0x25b   : > { %671 = sbr.rel (%p999_p13) target bundleno = 889 (0x379), region = 68 }
 0x260   : > { %v701_v17 = vld [vmem:[#allocation4] sm:$0xff]  ;;  %v1323_v19 = vmov 0   ;;  %v702_v20 = vld [vmem:[#allocation4 + $0x8] sm:$0xff]  ;;  %v681_v22 = vld [vmem:[#allocation8] sm:$0xff]  ;;  %vm787_vm5 = vcmask 7168  }
 0x261   : > { %v685_v18 = vld [vmem:[#allocation2] sm:$0xff]  ;;  %1131 = vset.pattern.permute.xlu1 %v1323_v19  ;;  %1130 = vset.pattern.permute.xlu0 %v1323_v19  ;;  %v686_v21 = vld [vmem:[#allocation2 + $0x8] sm:$0xff]  ;;  %v676_v25 = vld [vmem:[#allocation7] sm:$0xff] }
 0x262   : > { %705 = vperm.xlu1 %1131, %v701_v17   ;;  %689 = vperm.xlu0 %1130, %v685_v18   ;;  %v682_v23 = vld [vmem:[#allocation8 + $0x18] sm:$0xff]  ;;  %v675_v24 = vld [vmem:[#allocation7 + $0x10] sm:$0xff]  ;;  %v683_v36 = vld [vmem:[#allocation8 + $0x8] sm:$0xff] }
 0x263   : > { %v684_v37 = vld [vmem:[#allocation8 + $0x10] sm:$0xff]  ;;  %v677_v38 = vld [vmem:[#allocation7 + $0x18] sm:$0xff]  ;;  %v678_v39 = vld [vmem:[#allocation7 + $0x8] sm:$0xff] }
 0x26a   : > { %710 = vperm.xlu1 %1131, %v702_v20   ;;  %694 = vperm.xlu0 %1130, %v686_v21  }
 0x2d4   : > { %v706_v26 = vpop.permute.xlu1 %705  ;;  %v690_v27 = vpop.permute.xlu0 %689 }
 0x2d5   : > { %v1505_v28 = vsub.f32 %v681_v22, %v706_v26  ;;  %v1507_v29 = vsub.f32 %v682_v23, %v706_v26  ;;  %v1509_v30 = vsub.f32 %v675_v24, %v690_v27  ;;  %v1511_v31 = vsub.f32 %v676_v25, %v690_v27 }
 0x2d7   : > { %v725_v32 = vmul.f32 1.442695, %v1505_v28  ;;  %v727_v33 = vmul.f32 1.442695, %v1507_v29  ;;  %v717_v34 = vmul.f32 1.442695, %v1509_v30 }
 0x2d8   : > { %v719_v35 = vmul.f32 1.442695, %v1511_v31 }
 0x2d9   : > { %1132 = vpow2.f32 %v725_v32 }
 0x2da   : > { %1134 = vpow2.f32 %v727_v33 }
 0x2db   : > { %1136 = vpow2.f32 %v717_v34 }
 0x2dc   : > { %1138 = vpow2.f32 %v719_v35  ;;  %v711_v40 = vpop.permute.xlu1 %710  ;;  %v695_v41 = vpop.permute.xlu0 %694 }
 0x2dd   : > { %v1517_v42 = vsub.f32 %v683_v36, %v711_v40  ;;  %v1519_v43 = vsub.f32 %v684_v37, %v711_v40  ;;  %v1521_v44 = vsub.f32 %v677_v38, %v695_v41  ;;  %v1523_v45 = vsub.f32 %v678_v39, %v695_v41  ;;  %v777_v40 = vld [vmem:[#allocation6] sm:$0xff] }
 0x2df   : > { %v1133_v46 = vpop.eup %1132  ;;  %v729_v47 = vmul.f32 1.442695, %v1517_v42  ;;  %v731_v48 = vmul.f32 1.442695, %v1519_v43  ;;  %v721_v49 = vmul.f32 1.442695, %v1521_v44 }
 0x2e0   : > { %v1135_v50 = vpop.eup %1134  ;;  %v733_v51 = vmul.f32 0.5, %v1133_v46  ;;  %v723_v52 = vmul.f32 1.442695, %v1523_v45 }
 0x2e1   : > { %v1137_v53 = vpop.eup %1136  ;;  %v734_v54 = vmul.f32 0.5, %v1135_v50  ;;  %1140 = vpow2.f32 %v729_v47 }
 0x2e2   : > { %v1139_v55 = vpop.eup %1138  ;;  %v737_v56 = vmul.f32 0.5, %v1137_v53  ;;  %1142 = vpow2.f32 %v731_v48 }
 0x2e3   : > { %v738_v57 = vmul.f32 0.5, %v1139_v55  ;;  %1144 = vpow2.f32 %v721_v49 }
 0x2e4   : > { %v741_v58 = vadd.f32 %v737_v56, %v733_v51  ;;  %1146 = vpow2.f32 %v723_v52 }
 0x2e5   : > { %v742_v59 = vadd.f32 %v738_v57, %v734_v54 }
 0x2e6   : > { %v745_v60 = vmax.f32 %v741_v58, 1.1754944e-38 }
 0x2e7   : > { %v1141_v61 = vpop.eup %1140  ;;  %v746_v62 = vmax.f32 %v742_v59, 1.1754944e-38 }
 0x2e8   : > { %v1143_v63 = vpop.eup %1142  ;;  %1148 = vlog2.f32 %v745_v60  ;;  %v735_v0 = vmul.f32 0.5, %v1141_v61 }
 0x2e9   : > { %v1145_v1 = vpop.eup %1144  ;;  %1150 = vlog2.f32 %v746_v62  ;;  %v736_v2 = vmul.f32 0.5, %v1143_v63 }
 0x2ea   : > { %v1147_v3 = vpop.eup %1146  ;;  %v739_v4 = vmul.f32 0.5, %v1145_v1 }
 0x2eb   : > { %v740_v5 = vmul.f32 0.5, %v1147_v3 }
 0x2ec   : > { %v743_v6 = vadd.f32 %v739_v4, %v735_v0 }
 0x2ed   : > { %v744_v7 = vadd.f32 %v740_v5, %v736_v2 }
 0x2ee   : > { %v1149_v8 = vpop.eup %1148  ;;  %v747_v9 = vmax.f32 %v743_v6, 1.1754944e-38 }
 0x2ef   : > { %v1151_v10 = vpop.eup %1150  ;;  %v750_v11 = vmul.f32 0.6931472, %v1149_v8  ;;  %v748_v12 = vmax.f32 %v744_v7, 1.1754944e-38 }
 0x2f0   : > { %v752_v13 = vmul.f32 0.6931472, %v1151_v10  ;;  %1152 = vlog2.f32 %v747_v9 }
 0x2f1   : > { %v765_v14 = vsub.f32 %v1509_v30, %v750_v11  ;;  %1154 = vlog2.f32 %v748_v12  ;;  %v757_v15 = vsub.f32 %v1505_v28, %v750_v11 }
 0x2f2   : > { %v766_v16 = vsub.f32 %v1511_v31, %v752_v13  ;;  %v758_v17 = vsub.f32 %v1507_v29, %v752_v13 }
 0x2f3   : > { %v761_v18 = vmul.f32 %v757_v15, %v733_v51  ;;  %v769_v19 = vmul.f32 %v765_v14, %v737_v56 }
 0x2f4   : > { %v762_v20 = vmul.f32 %v758_v17, %v734_v54  ;;  %v770_v21 = vmul.f32 %v766_v16, %v738_v57 }
 0x2f5   : > { %v773_v22 = vadd.f32 %v769_v19, %v761_v18 }
 0x2f6   : > { %v1153_v23 = vpop.eup %1152  ;;  %v774_v24 = vadd.f32 %v770_v21, %v762_v20 }
 0x2f7   : > { %v1155_v25 = vpop.eup %1154  ;;  %v754_v26 = vmul.f32 0.6931472, %v1153_v23 }
 0x2f8   : > { %v756_v27 = vmul.f32 0.6931472, %v1155_v25  ;;  %v779_v32 = vadd.f32 %v774_v24, %v773_v22 }
 0x2f9   : > { %v759_v30 = vsub.f32 %v1517_v42, %v754_v26  ;;  %v767_v33 = vsub.f32 %v1521_v44, %v754_v26  ;;  %v778_v42 = vld [vmem:[#allocation6 + $0x8] sm:$0xff] }
 0x2fa   : > { %v760_v28 = vsub.f32 %v1519_v43, %v756_v27  ;;  %v768_v31 = vsub.f32 %v1523_v45, %v756_v27  ;;  %780 = vadd.xlane.f32.xlu2 %v779_v32 }
 0x2fb   : > { %v771_v29 = vmul.f32 %v767_v33, %v739_v4  ;;  %v763_v34 = vmul.f32 %v759_v30, %v735_v0 }
 0x2fc   : > { %v772_v35 = vmul.f32 %v768_v31, %v740_v5  ;;  %v764_v36 = vmul.f32 %v760_v28, %v736_v2 }
 0x2fd   : > { %v775_v37 = vadd.f32 %v771_v29, %v763_v34 }
 0x2fe   : > { %v776_v38 = vadd.f32 %v772_v35, %v764_v36 }
 0x300   : > { %v782_v39 = vadd.f32 %v776_v38, %v775_v37 }
 0x302   : > { %783 = vadd.xlane.f32.xlu2 %v782_v39 }
 0x36d   : > { %v781_v41 = vpop.xlane.xlu2 %780 }
 0x36e   : > { %v785_v46 = vadd.f32 %v781_v41, %v777_v40 }
 0x370   : > { %788 = vst.msk [vmem:[#allocation6] sm:$0xff] %vm787_vm5, %v785_v46 }
 0x375   : > { %v784_v44 = vpop.xlane.xlu2 %783 }
 0x376   : > { %v786_v47 = vadd.f32 %v784_v44, %v778_v42 }
 0x378   : > { %789 = vst.msk [vmem:[#allocation6 + $0x8] sm:$0xff] %vm787_vm5, %v786_v47 }
 0x379 PF: > { %791 = sbr.rel (!%p364_p11) target bundleno = 897 (0x381), region = 72  ;;  %v792_v43 = vld [vmem:[#allocation6] sm:$0xff] (%p364_p11)  ;;  %vm794_vm6 = vcmask (%p364_p11), 7168  }
 0x37a   : > { %795 = vst.msk [vmem:[%s1558_s4] sm:$0xff] (%p364_p11), %vm794_vm6, %v792_v43 }
 0x37f   : > { %v793_v45 = vld [vmem:[#allocation6 + $0x8] sm:$0xff] }
 0x380   : > { %796 = vst.msk [vmem:[%s1558_s4 + $0x8] sm:$0xff] %vm794_vm6, %v793_v45 }
 0x381 PF: > { %s16_s17 = sadd.s32 1, %s1310_s17   ;;  %s1563_s15 = smov %s1306_s16 }
 0x382   : > { %p13_p0 = scmp.ge.s32.totalorder %s16_s17, 4   ;;  %s1564_s16 = smov %s1566_s19 }
 0x384   :  { %15 = sbr.rel (!%p13_p0) target bundleno = 3 (0x3), region = 120 }
 0x389   :  { %819 = vsyncpa [#allocation10], 1 }
 0x38a   :  { %821 = vsyncpa [#allocation10 + $0x1], 1 }
 0x38b   :  { %822 = vsyncpa [#allocation12], 1 }

</bundles_post_ra>
